<compile_context>
chip_gen: v6e
topology: v6e:2x2x1
jax: 0.10.0
libtpu: 0.0.40
codegen_flags: <defaults>
</compile_context>

<pallas_src>
import jax
import jax.numpy as jnp
from jax.experimental import pallas as pl
from jax.experimental.pallas import tpu as pltpu


def _softmax_last(logits):
    m = jnp.max(logits, axis=-1, keepdims=True)
    e = jnp.exp(logits - m)
    # approx=False keeps us comfortably inside the 1e-4 verification tolerance
    # (approx=True can flip the h1 >= h2 routing on near-ties).
    return e * pl.reciprocal(jnp.sum(e, axis=-1, keepdims=True), approx=False)


def cross_attention_sp_kernel(scalars_ref,          # SMEM: [1 - sigmoid(gating), h_temp]
                              x_ref, y_ref,         # (Bb, N, D), (Bb, M, D)  input dtype
                              w_ref,                 # (2, D, D) = scale * U^T diag(|S_h|) U
                              gpos2_ref,             # (2N, M)  = sigmoid(gating) * pos_softmax, head-tiled
                              out_ref, heat_ref):    # (Bb, N, D), (Bb, 1, N)
    one_minus_g = scalars_ref[0]
    h_temp = scalars_ref[1]

    x = x_ref[...]                                   # (Bb, N, D)
    y = y_ref[...]                                   # (Bb, M, D)
    bb, n, d = x.shape

    # ---- spectral projections (both heads), flattened (Bb*N, D) @ (D, D) on the MXU ----
    xf = x.reshape(bb * n, d)
    x1 = jnp.dot(xf, w_ref[0], preferred_element_type=jnp.float32).reshape(bb, n, d)
    x2 = jnp.dot(xf, w_ref[1], preferred_element_type=jnp.float32).reshape(bb, n, d)
    # TODO(synk): when D % 128 == 0, column-concat W1|W2 into (D, 2D) and run ONE matmul.
    xs = jnp.concatenate([x1, x2], axis=1)           # (Bb, 2N, D), head-stacked rows

    # ---- one wide pass over both heads: scores -> softmax -> gated blend -> entropy ----
    yf = y.astype(jnp.float32)
    s = jnp.einsum('bnd,bmd->bnm', xs, yf,
                   preferred_element_type=jnp.float32)          # (Bb, 2N, M)
    a = one_minus_g * _softmax_last(s) + gpos2_ref[...][None]   # (Bb, 2N, M)

    e = jnp.sum(-a * jnp.log(a + 1e-8), axis=-1)                # (Bb, 2N)
    h = 2.0 - 2.0 * jax.nn.sigmoid(h_temp * e)                  # (Bb, 2N)

    # ---- split heads, hard fg/bg routing ----
    h1, h2 = h[:, :n], h[:, n:]
    fgbg = h1 >= h2                                             # (Bb, N) bool
    heat_ref[...] = jnp.where(fgbg, h1, h2).reshape(bb, 1, n)   # lane-dense (Bb, 1, N)

    attn = jnp.where(fgbg[..., None], a[:, :n], a[:, n:])       # (Bb, N, M)
    out = jnp.einsum('bnm,bmd->bnd', attn, yf,
                     preferred_element_type=jnp.float32)        # (Bb, N, D)
    out_ref[...] = out.astype(out_ref.dtype)


def _working_set_bytes(bb, N, M, D, x_itemsize, y_itemsize):
    """Conservative per-grid-step VMEM estimate: double-buffered I/O + live f32 temporaries."""
    io = 2 * bb * N * D * x_itemsize            # x (double-buffered)
    io += 2 * bb * M * D * y_itemsize           # y
    io += 2 * bb * N * D * 4                    # out
    io += 2 * bb * N * 4                        # heat
    inv = 2 * (2 * D * D * 4 + 2 * N * M * 4)   # W12 + gpos2 (grid-invariant, double-buffered)
    tmp = bb * 2 * N * D * 4                    # xs
    tmp += 3 * bb * 2 * N * M * 4               # scores / softmax / blended attn
    tmp += bb * N * M * 4                       # routed attn
    tmp += bb * N * D * 4                       # out temp
    return io + inv + tmp


def _pick_block_b(B, N, M, D, x_itemsize, y_itemsize, vmem_budget_bytes):
    """Largest divisor of B within the byte budget; cap at B//2 so grid >= 2
    (pipelining on all chips + megacore sharding on v7x) whenever B > 1."""
    cap = max(1, B // 2) if B > 1 else 1
    best = 1
    for bb in range(1, cap + 1):
        if B % bb == 0 and _working_set_bytes(bb, N, M, D, x_itemsize, y_itemsize) <= vmem_budget_bytes:
            best = bb
    return best


def cross_attention_sp(x, y, coords, params, *, block_b=None):
    """x: (B, N, D), y: (B, M, D), coords: (N, M, 6). Returns (out (B,N,D), heat (B,N,1))."""
    B, N, D = x.shape
    M = y.shape[1]

    U = params["U"].astype(jnp.float32)                      # (D, D)
    s1 = jnp.abs(params["S1"].astype(jnp.float32))           # (D, 1)
    s2 = jnp.abs(params["S2"].astype(jnp.float32))
    scale = jnp.float32(params["scale"])
    g = jax.nn.sigmoid(params["gating"]).astype(jnp.float32)
    h_temp = params["h_temp"].astype(jnp.float32)
    p_abs = jnp.abs(params["p_temp"]).astype(jnp.float32)

    # Parameter-only folding (once per call): W_h = scale * U^T @ diag(|S_h|) @ U.
    W1 = scale * (U.T @ (s1 * U))
    W2 = scale * (U.T @ (s2 * U))
    W12 = jnp.stack([W1, W2], axis=0)                        # (2, D, D)

    # Batch-invariant positional softmax, pre-gated and pre-tiled for both heads.
    pos_logit = -p_abs * jnp.einsum('nmk,nk->nm', coords.astype(jnp.float32),
                                    params["pos_emb"][:, :, 0].astype(jnp.float32))
    gpos = g * jax.nn.softmax(pos_logit, axis=-1)            # (N, M)
    gpos2 = jnp.concatenate([gpos, gpos], axis=0)            # (2N, M)

    scalars = jnp.stack([1.0 - g, h_temp]).astype(jnp.float32)   # (2,) -> SMEM

    # Per-chip byte-budgeted tiling (v7x: 64 MiB VMEM; v5e/v6e: 128 MiB).
    try:
        vmem_cap = int(pltpu.get_tpu_info().vmem_capacity_bytes)
    except Exception:
        vmem_cap = 64 << 20
    x_it = jnp.dtype(x.dtype).itemsize
    y_it = jnp.dtype(y.dtype).itemsize
    Bb = block_b or _pick_block_b(B, N, M, D, x_it, y_it, int(0.55 * vmem_cap))
    ws = _working_set_bytes(Bb, N, M, D, x_it, y_it)
    vmem_limit = int(min(0.75 * vmem_cap, max(32 << 20, 2 * ws)))

    cost = pl.CostEstimate(
        flops=4 * B * N * D * D + 6 * B * N * M * D,
        transcendentals=5 * B * 2 * N * M,
        bytes_accessed=(B * N * D * x_it + B * M * D * y_it
                        + B * N * D * x_it + B * N * 4
                        + 2 * D * D * 4 + 2 * N * M * 4),
    )

    out, heat = pl.pallas_call(
        cross_attention_sp_kernel,
        out_shape=(
            jax.ShapeDtypeStruct((B, N, D), x.dtype),
            jax.ShapeDtypeStruct((B, 1, N), jnp.float32),    # heat, lane-dense on N
        ),
        grid=(B // Bb,),
        in_specs=[
            pl.BlockSpec(memory_space=pltpu.MemorySpace.SMEM),      # scalars
            pl.BlockSpec((Bb, N, D), lambda b: (b, 0, 0)),          # x
            pl.BlockSpec((Bb, M, D), lambda b: (b, 0, 0)),          # y
            pl.BlockSpec((2, D, D), lambda b: (0, 0, 0)),           # W12
            pl.BlockSpec((2 * N, M), lambda b: (0, 0)),             # gate * pos softmax (x2 heads)
        ],
        out_specs=(
            pl.BlockSpec((Bb, N, D), lambda b: (b, 0, 0)),          # out
            pl.BlockSpec((Bb, 1, N), lambda b: (b, 0, 0)),          # heat
        ),
        compiler_params=pltpu.CompilerParams(
            dimension_semantics=("parallel",),
            vmem_limit_bytes=vmem_limit),
        cost_estimate=cost,
    )(scalars, x, y, W12, gpos2)

    return out, heat.reshape(B, N, 1)


def cross_attention_sp_reference(x, y, coords, params):
    """Pure-JAX replica of the PyTorch forward for verification."""
    B, N, D = x.shape
    U, S1, S2 = params["U"], params["S1"], params["S2"]
    pos_emb = params["pos_emb"]
    scale = params["scale"]
    g = jax.nn.sigmoid(params["gating"])
    h_temp = params["h_temp"]
    p_temp = params["p_temp"]

    x1 = x @ U.T @ jnp.diag(jnp.abs(S1[:, 0])) @ U
    x2 = x @ U.T @ jnp.diag(jnp.abs(S2[:, 0])) @ U
    xs = jnp.stack([x1, x2], axis=1)                                    # (B, 2, N, D)

    patch = jax.nn.softmax(
        jnp.einsum("bhnd,bmd->bhnm", xs, y) * scale, axis=-1)           # (B, 2, N, M)

    pos_logit = -jnp.abs(p_temp) * jnp.einsum("nmk,nk->nm", coords, pos_emb[:, :, 0])
    pos = jax.nn.softmax(pos_logit, axis=-1)                            # (N, M)
    pos = jnp.broadcast_to(pos[None, None], patch.shape)

    attn = (1.0 - g) * patch + g * pos                                  # (B, 2, N, M)

    entropy = jnp.sum(-attn * jnp.log(attn + 1e-8), axis=-1).transpose(0, 2, 1)  # (B, N, 2)
    hmap = 2.0 - 2.0 * jax.nn.sigmoid(h_temp * entropy)
    fgbg = hmap[..., 0] >= hmap[..., 1]                                 # (B, N)
    route = jnp.stack([fgbg, ~fgbg], axis=-1).astype(hmap.dtype)        # (B, N, 2)

    heat = jnp.sum(hmap * route, axis=-1, keepdims=True)                # (B, N, 1)
    attn_r = jnp.sum(attn * route.transpose(0, 2, 1)[..., None], axis=1)  # (B, N, M)
    out = attn_r @ y                                                    # (B, N, D)
    return out, heat


def init_params(key, dim, num_patches):
    """Deterministic synthetic init matching the module's parameter shapes."""
    k_u, k_s1, k_s2, k_pos = jax.random.split(key, 4)
    return {
        "U": (jax.random.normal(k_u, (dim, dim), jnp.float32)
              * (2.0 / (dim + dim)) ** 0.5),                  # xavier-ish
        "S1": jax.random.uniform(k_s1, (dim, 1), jnp.float32, -1.0, 1.0),
        "S2": jax.random.uniform(k_s2, (dim, 1), jnp.float32, -1.0, 1.0),
        "pos_emb": jnp.clip(jax.random.normal(k_pos, (num_patches, 6, 1), jnp.float32) * 0.3 + 0.5,
                            0.0, 1.0),                        # trunc_normal_(a=0, b=1) surrogate
        "gating": jnp.float32(1.0),
        "h_temp": jnp.float32(0.1),
        "p_temp": jnp.float32(1.0),
        "scale": jnp.float32(dim ** (-0.5)),                  # a_temp=False -> plain scalar
    }


if __name__ == "__main__":
    B, N, M, D = 2, 8, 8, 32      # batch, num_patches (x tokens), y tokens, dim

    key = jax.random.PRNGKey(0)
    kx, ky, kc, kp = jax.random.split(key, 4)
    x = jax.random.normal(kx, (B, N, D), jnp.float32)
    y = jax.random.normal(ky, (B, M, D), jnp.float32)
    coords = jax.random.normal(kc, (N, M, 6), jnp.float32)

    params = init_params(kp, D, N)

    out, heat = cross_attention_sp(x, y, coords, params)
    out = jax.block_until_ready(out)
    heat = jax.block_until_ready(heat)

    ref_out, ref_heat = cross_attention_sp_reference(x, y, coords, params)
    assert out.shape == (B, N, D) and heat.shape == (B, N, 1)
    assert jnp.allclose(out, ref_out, rtol=1e-4, atol=1e-4), "output mismatch vs reference"
    assert jnp.allclose(heat, ref_heat, rtol=1e-4, atol=1e-4), "heat map mismatch vs reference"

    print("KERNEL_OK")
</pallas_src>

<mosaic_0001>
module attributes {stable_mosaic.version = 11 : i64} {
  func.func @cross_attention_sp_kernel(%arg0: i32, %arg1: memref<2xf32, #tpu.memory_space<smem>>, %arg2: memref<1x8x32xf32, #tpu.memory_space<vmem>>, %arg3: memref<1x8x32xf32, #tpu.memory_space<vmem>>, %arg4: memref<2x32x32xf32, #tpu.memory_space<vmem>>, %arg5: memref<16x8xf32, #tpu.memory_space<vmem>>, %arg6: memref<1x8x32xf32, #tpu.memory_space<vmem>>, %arg7: memref<1x1x8xf32, #tpu.memory_space<vmem>>) attributes {dimension_semantics = [#tpu.dimension_semantics<parallel>], iteration_bounds = array<i64: 2>, scalar_prefetch = 0 : i64, scratch_operands = 0 : i64, tpu.core_type = #tpu.core_type<tc>, window_params = [{transform_indices = @transform_0, window_bounds = array<i64: 2>}, {transform_indices = @transform_1, window_bounds = array<i64: 1, 8, 32>}, {transform_indices = @transform_2, window_bounds = array<i64: 1, 8, 32>}, {pipeline_mode = #tpu.pipeline_mode<synchronous>, transform_indices = @transform_3, window_bounds = array<i64: 2, 32, 32>}, {pipeline_mode = #tpu.pipeline_mode<synchronous>, transform_indices = @transform_4, window_bounds = array<i64: 16, 8>}, {transform_indices = @transform_5, window_bounds = array<i64: 1, 8, 32>}, {transform_indices = @transform_6, window_bounds = array<i64: 1, 1, 8>}]} {
    %c0 = arith.constant 0 : index
    %0 = memref.load %arg1[%c0] : memref<2xf32, #tpu.memory_space<smem>>
    %c1 = arith.constant 1 : index
    %1 = memref.load %arg1[%c1] : memref<2xf32, #tpu.memory_space<smem>>
    %c0_0 = arith.constant 0 : index
    %c0_1 = arith.constant 0 : index
    %c0_2 = arith.constant 0 : index
    %2 = vector.load %arg2[%c0_0, %c0_1, %c0_2] : memref<1x8x32xf32, #tpu.memory_space<vmem>>, vector<1x8x32xf32>
    %c0_3 = arith.constant 0 : index
    %c0_4 = arith.constant 0 : index
    %c0_5 = arith.constant 0 : index
    %3 = vector.load %arg3[%c0_3, %c0_4, %c0_5] : memref<1x8x32xf32, #tpu.memory_space<vmem>>, vector<1x8x32xf32>
    %4 = vector.shape_cast %2 : vector<1x8x32xf32> to vector<8x32xf32>
    %c0_6 = arith.constant 0 : index
    %c0_7 = arith.constant 0 : index
    %c0_8 = arith.constant 0 : index
    %5 = vector.load %arg4[%c0_6, %c0_7, %c0_8] : memref<2x32x32xf32, #tpu.memory_space<vmem>>, vector<1x32x32xf32>
    %6 = vector.shape_cast %5 : vector<1x32x32xf32> to vector<32x32xf32>
    %cst = arith.constant dense<0.000000e+00> : vector<8x32xf32>
    %7 = tpu.matmul %4, %6, %cst {dimension_numbers = #tpu.dot_dimension_numbers<[1], [0], [0], [1], [0, 0, 1, 1], [], []>} : vector<8x32xf32>, vector<32x32xf32>, vector<8x32xf32> -> vector<8x32xf32>
    %8 = vector.shape_cast %7 : vector<8x32xf32> to vector<1x8x32xf32>
    %c1_9 = arith.constant 1 : index
    %c0_10 = arith.constant 0 : index
    %c0_11 = arith.constant 0 : index
    %9 = vector.load %arg4[%c1_9, %c0_10, %c0_11] : memref<2x32x32xf32, #tpu.memory_space<vmem>>, vector<1x32x32xf32>
    %10 = vector.shape_cast %9 : vector<1x32x32xf32> to vector<32x32xf32>
    %cst_12 = arith.constant dense<0.000000e+00> : vector<8x32xf32>
    %11 = tpu.matmul %4, %10, %cst_12 {dimension_numbers = #tpu.dot_dimension_numbers<[1], [0], [0], [1], [0, 0, 1, 1], [], []>} : vector<8x32xf32>, vector<32x32xf32>, vector<8x32xf32> -> vector<8x32xf32>
    %12 = vector.shape_cast %11 : vector<8x32xf32> to vector<1x8x32xf32>
    %13 = tpu.concatenate %8, %12 in 1 : vector<1x8x32xf32>, vector<1x8x32xf32> -> vector<1x16x32xf32>
    "tpu.trace_start"() <{level = 10 : i32, message = "bnd,bmd->bnm"}> : () -> ()
    %cst_13 = arith.constant dense<0.000000e+00> : vector<1x16x8xf32>
    %14 = tpu.matmul %13, %3, %cst_13 {dimension_numbers = #tpu.dot_dimension_numbers<[2], [2], [1], [1], [0, 0, 0, 1, 1, 1], [0], [0]>} : vector<1x16x32xf32>, vector<1x8x32xf32>, vector<1x16x8xf32> -> vector<1x16x8xf32>
    "tpu.trace_stop"() : () -> ()
    %cst_14 = arith.constant dense<0xFF800000> : vector<1x16xf32>
    %15 = vector.multi_reduction <maximumf>, %14, %cst_14 [2] : vector<1x16x8xf32> to vector<1x16xf32>
    %16 = vector.shape_cast %15 : vector<1x16xf32> to vector<1x16x1xf32>
    %17 = vector.broadcast %16 : vector<1x16x1xf32> to vector<1x16x8xf32>
    %18 = arith.subf %14, %17 : vector<1x16x8xf32>
    %19 = math.exp %18 : vector<1x16x8xf32>
    %cst_15 = arith.constant dense<0.000000e+00> : vector<1x16xf32>
    %20 = vector.multi_reduction <add>, %19, %cst_15 [2] : vector<1x16x8xf32> to vector<1x16xf32>
    %21 = vector.shape_cast %20 : vector<1x16xf32> to vector<1x16x1xf32>
    %22 = tpu.reciprocal %21 : vector<1x16x1xf32> -> vector<1x16x1xf32>
    %23 = vector.broadcast %22 : vector<1x16x1xf32> to vector<1x16x8xf32>
    %24 = arith.mulf %19, %23 : vector<1x16x8xf32>
    %25 = vector.broadcast %0 : f32 to vector<1x16x8xf32>
    %26 = arith.mulf %25, %24 : vector<1x16x8xf32>
    %c0_16 = arith.constant 0 : index
    %c0_17 = arith.constant 0 : index
    %27 = vector.load %arg5[%c0_16, %c0_17] : memref<16x8xf32, #tpu.memory_space<vmem>>, vector<16x8xf32>
    %28 = vector.shape_cast %27 : vector<16x8xf32> to vector<1x16x8xf32>
    %29 = arith.addf %26, %28 : vector<1x16x8xf32>
    %cst_18 = arith.constant 0.000000e+00 : f32
    %30 = vector.broadcast %cst_18 : f32 to vector<1x16x8xf32>
    %31 = arith.subf %30, %29 : vector<1x16x8xf32>
    %cst_19 = arith.constant 9.99999993E-9 : f32
    %32 = vector.broadcast %cst_19 : f32 to vector<1x16x8xf32>
    %33 = arith.addf %29, %32 : vector<1x16x8xf32>
    %34 = math.log %33 : vector<1x16x8xf32>
    %35 = arith.mulf %31, %34 : vector<1x16x8xf32>
    %cst_20 = arith.constant dense<0.000000e+00> : vector<1x16xf32>
    %36 = vector.multi_reduction <add>, %35, %cst_20 [2] : vector<1x16x8xf32> to vector<1x16xf32>
    %37 = vector.broadcast %1 : f32 to vector<1x16xf32>
    %38 = arith.mulf %37, %36 : vector<1x16xf32>
    %39 = arith.negf %38 : vector<1x16xf32>
    %40 = math.exp %39 : vector<1x16xf32>
    %cst_21 = arith.constant 1.000000e+00 : f32
    %41 = vector.broadcast %cst_21 : f32 to vector<1x16xf32>
    %42 = arith.addf %41, %40 : vector<1x16xf32>
    %43 = arith.divf %41, %42 : vector<1x16xf32>
    %cst_22 = arith.constant 2.000000e+00 : f32
    %44 = vector.broadcast %cst_22 : f32 to vector<1x16xf32>
    %45 = arith.mulf %44, %43 : vector<1x16xf32>
    %cst_23 = arith.constant 2.000000e+00 : f32
    %46 = vector.broadcast %cst_23 : f32 to vector<1x16xf32>
    %47 = arith.subf %46, %45 : vector<1x16xf32>
    %48 = vector.extract_strided_slice %47 {offsets = [0, 0], sizes = [1, 8], strides = [1, 1]} : vector<1x16xf32> to vector<1x8xf32>
    %49 = vector.extract_strided_slice %47 {offsets = [0, 8], sizes = [1, 8], strides = [1, 1]} : vector<1x16xf32> to vector<1x8xf32>
    %50 = arith.cmpf oge, %48, %49 : vector<1x8xf32>
    %51 = arith.select %50, %48, %49 : vector<1x8xi1>, vector<1x8xf32>
    %52 = vector.shape_cast %51 : vector<1x8xf32> to vector<1x1x8xf32>
    %c0_24 = arith.constant 0 : index
    %c0_25 = arith.constant 0 : index
    %c0_26 = arith.constant 0 : index
    %53 = vector.load %arg7[%c0_24, %c0_25, %c0_26] : memref<1x1x8xf32, #tpu.memory_space<vmem>>, vector<1x1x8xf32>
    tpu.vector_store %arg7[%c0_24, %c0_25, %c0_26], %52 {strides = array<i32>} : memref<1x1x8xf32, #tpu.memory_space<vmem>>, vector<1x1x8xf32>,
    %54 = vector.shape_cast %50 : vector<1x8xi1> to vector<1x8x1xi1>
    %55 = vector.extract_strided_slice %29 {offsets = [0, 0, 0], sizes = [1, 8, 8], strides = [1, 1, 1]} : vector<1x16x8xf32> to vector<1x8x8xf32>
    %56 = vector.extract_strided_slice %29 {offsets = [0, 8, 0], sizes = [1, 8, 8], strides = [1, 1, 1]} : vector<1x16x8xf32> to vector<1x8x8xf32>
    %57 = vector.shape_cast %54 : vector<1x8x1xi1> to vector<1x8x1xi1>
    %58 = vector.broadcast %57 : vector<1x8x1xi1> to vector<1x8x8xi1>
    %59 = arith.select %58, %55, %56 : vector<1x8x8xi1>, vector<1x8x8xf32>
    "tpu.trace_start"() <{level = 10 : i32, message = "bnm,bmd->bnd"}> : () -> ()
    %cst_27 = arith.constant dense<0.000000e+00> : vector<1x8x32xf32>
    %60 = tpu.matmul %59, %3, %cst_27 {dimension_numbers = #tpu.dot_dimension_numbers<[2], [1], [1], [2], [0, 0, 0, 1, 1, 2], [0], [0]>} : vector<1x8x8xf32>, vector<1x8x32xf32>, vector<1x8x32xf32> -> vector<1x8x32xf32>
    "tpu.trace_stop"() : () -> ()
    %c0_28 = arith.constant 0 : index
    %c0_29 = arith.constant 0 : index
    %c0_30 = arith.constant 0 : index
    %61 = vector.load %arg6[%c0_28, %c0_29, %c0_30] : memref<1x8x32xf32, #tpu.memory_space<vmem>>, vector<1x8x32xf32>
    tpu.vector_store %arg6[%c0_28, %c0_29, %c0_30], %60 {strides = array<i32>} : memref<1x8x32xf32, #tpu.memory_space<vmem>>, vector<1x8x32xf32>,
    return
  }
  func.func @transform_0(%arg0: i32) -> i32 {
    %c0_i32 = arith.constant 0 : i32
    %c0_i32_0 = arith.constant 0 : i32
    return %c0_i32 : i32
  }
  func.func @transform_1(%arg0: i32) -> (i32, i32, i32) {
    %c0_i32 = arith.constant 0 : i32
    %c0_i32_0 = arith.constant 0 : i32
    %c0_i32_1 = arith.constant 0 : i32
    return %arg0, %c0_i32, %c0_i32_0 : i32, i32, i32
  }
  func.func @transform_2(%arg0: i32) -> (i32, i32, i32) {
    %c0_i32 = arith.constant 0 : i32
    %c0_i32_0 = arith.constant 0 : i32
    %c0_i32_1 = arith.constant 0 : i32
    return %arg0, %c0_i32, %c0_i32_0 : i32, i32, i32
  }
  func.func @transform_3(%arg0: i32) -> (i32, i32, i32) {
    %c0_i32 = arith.constant 0 : i32
    %c0_i32_0 = arith.constant 0 : i32
    %c0_i32_1 = arith.constant 0 : i32
    %c0_i32_2 = arith.constant 0 : i32
    return %c0_i32, %c0_i32_0, %c0_i32_1 : i32, i32, i32
  }
  func.func @transform_4(%arg0: i32) -> (i32, i32) {
    %c0_i32 = arith.constant 0 : i32
    %c0_i32_0 = arith.constant 0 : i32
    %c0_i32_1 = arith.constant 0 : i32
    return %c0_i32, %c0_i32_0 : i32, i32
  }
  func.func @transform_5(%arg0: i32) -> (i32, i32, i32) {
    %c0_i32 = arith.constant 0 : i32
    %c0_i32_0 = arith.constant 0 : i32
    %c0_i32_1 = arith.constant 0 : i32
    return %arg0, %c0_i32, %c0_i32_0 : i32, i32, i32
  }
  func.func @transform_6(%arg0: i32) -> (i32, i32, i32) {
    %c0_i32 = arith.constant 0 : i32
    %c0_i32_0 = arith.constant 0 : i32
    %c0_i32_1 = arith.constant 0 : i32
    return %arg0, %c0_i32, %c0_i32_0 : i32, i32, i32
  }
}

</mosaic_0001>

<bundles_post_ra>
// kernel: tpu_custom_call.1
= control target key start
LH: loop header
LB: loop body
LE: loop exit
PB: predicated region body
PF: predicated region fallthrough
CT: control target
= control target key end

     0   :  { %s1493_s0 = inlined_call_operand.vmem [shape: f32[2], index: 0, kind: input, shape index: {}]   ;;  %s1494_s1 = inlined_call_operand.vmem [shape: f32[2,8,32], index: 1, kind: input, shape index: {}]   ;;  %s1495_s2 = inlined_call_operand.hbm [shape: f32[2,8,32], index: 2, kind: input, shape index: {}]   ;;  %s1496_s3 = inlined_call_operand.hbm [shape: f32[2,32,32], index: 3, kind: input, shape index: {}]   ;;  %s1497_s4 = inlined_call_operand.vmem [shape: f32[16,8], index: 4, kind: input, shape index: {}]   ;;  %s1498_s5 = inlined_call_operand.hbm [shape: f32[2,8,32], index: 5, kind: output, shape index: {0}]   ;;  %s1499_s6 = inlined_call_operand.hbm [shape: f32[2,1,8], index: 6, kind: output, shape index: {1}]  }
   0x1   :  { %1504 = sst [smem:[#allocation17_spill]] %s1493_s0 }
   0x2   :  { %12 = vsyncpa [#allocation5], 0 }
   0x3   :  { %13 = vsyncpa [#allocation3], 0 }
   0x4   :  { %15 = vsyncpa [#allocation3 + $0x1], 0 }
   0x5   :  { %16 = vsyncpa [#allocation8], 0 }
   0x6   :  { %17 = vsyncpa [#allocation4], 0 }
   0x7   :  { %19 = vsyncpa [#allocation4 + $0x1], 0 }
   0x8   :  { %20 = vsyncpa [#allocation11], 0 }
   0x9   :  { %22 = vsyncpa [#allocation11 + $0x1], 0  ;;  %s1268_s21 = smov 0   ;;  %s1270_s22 = smov 0  }
   0xa   :  { %s1272_s23 = smov 0   ;;  %s1274_s24 = smov 0  }
   0xb LB: > { %s1289_s25 = sadd.s32 4294967295, %s1222_s24   ;;  %s881_s26 = sadd.s32 4294967294, %s1222_s24   ;;  %s1222_s24 = sphi %s1274_s24, %s1525_s24   ;;  %s1218_s23 = sphi %s1272_s23, %s1524_s23   ;;  %s1214_s22 = sphi %s1270_s22, %s1523_s22   ;;  %s1210_s21 = sphi %s1268_s21, %s1522_s21  }
   0xc   : > { %p95_p0 = scmp.ne.s32.totalorder %s1214_s22, %s1210_s21  ;;  %p1500_p1 = scmp.eq.s32.totalorder %s1289_s25, 0 }
   0xd   : > { %p167_p3 = scmp.eq.s32.totalorder %s881_s26, 1  ;;  %p882_p5 = scmp.ge.s32.totalorder %s1222_s24, 1 }
   0xe   : > { %p1298_p4 = por %p1500_p1, %p95_p0  ;;  %p200_p7 = scmp.lt.s32.totalorder %s1222_s24, 3 }
   0xf   : > { %p1303_p6 = por %p167_p3, %p95_p0  ;;  %s1507_s0 = sld [smem:[#allocation17_spill]] }
  0x10   : > { %s1505_s27 = scalar_select %p1298_p4, 1, 0 }
  0x11   : > { %s1506_s28 = scalar_select %p1303_p6, 1, 0 }
  0x12   : > { %p1311_p8 = pnand %p882_p5, %p200_p7  ;;  %s1224_s9 = smov [#allocation7]  }
  0x13   : > { %s223_s10 = sshll.u32 %s1224_s9, 4  ;;  %s224_s10 = int_to_ptr.vmem [resolvable:$true] %s223_s10 }
  0x14   : > { %s1508_s8 = scalar_select %p1311_p8, 1, 0 }
  0x15   : > { %s213_s7 = sshll.u32 %s1507_s0, 4  ;;  %p969_p10 = pneg %p1311_p8  ;;  %s214_s7 = int_to_ptr.vmem [resolvable:$true] %s213_s7 }
  0x16   : > { %s1051_s12 = scalar_lea.vmem %s214_s7, 16  ;;  %p1059_p5 = scmp.lt.s32.totalorder %s214_s7, %s214_s7 }
  0x17   : > { %p1320_p11 = pnand %p969_p10, %p1500_p1  ;;  %p1052_p12 = scmp.ne.s32.totalorder %s214_s7, %s1051_s12 }
  0x18   : > { %p1060_p7 = scmp.lt.s32.totalorder %s1051_s12, %s1051_s12 }
  0x19   : > { %p1053_p13 = pneg %p1320_p11 }
  0x1a   : > { %p1061_p9 = por %p1060_p7, %p1059_p5 }
  0x1b   : > { %p1054_p0 = pnand %p1053_p13, %p1052_p12 }
  0x1d   : > { %p1055_p3 = pneg %p1054_p0 }
  0x1f   : > { %p1062_p2 = pnand %p1061_p9, %p1055_p3 }
  0x21   : > { %1065 = shalt.err (!%p1062_p2)
}
  0x22   : > { %s1225_s13 = smov [#allocation2]   ;;  %s1077_s14 = scalar_lea.vmem %s224_s10, 1024 }
  0x23   : > { %972 = dma.vmem_to_smem (!%p1320_p11), %s214_s7, 16, %s1225_s13, [#allocation5]  }
  0x24   : > { %p1078_p10 = scmp.ne.s32.totalorder %s224_s10, %s1077_s14  ;;  %p1085_p4 = scmp.lt.s32.totalorder %s224_s10, %s224_s10 }
  0x25   : > { %p1086_p8 = scmp.lt.s32.totalorder %s1077_s14, %s1077_s14 }
  0x26   : > { %p1080_p1 = pnand %p1078_p10, %p1053_p13 }
  0x27   : > { %p1087_p12 = por %p1086_p8, %p1085_p4 }
  0x28   : > { %p1081_p6 = pneg %p1080_p1 }
  0x2a   : > { %p1088_p0 = pnand %p1087_p12, %p1081_p6 }
  0x2c   : > { %1091 = shalt.err (!%p1088_p0)
}
  0x2d   : > { %s1226_s15 = smov 128   ;;  %s1227_s16 = smov 8  }
  0x2e   : > { %975 = dma.hbm_to_vmem [thread:$0]  (!%p1320_p11), %s1496_s3, 1024, %s224_s10, [#allocation8], %s1226_s15, %s1226_s15, %s1227_s16  }
  0x2f   : > { %s1334_s19 = sadd.s32 1, %s1222_s24   ;;  %s82_s20 = sadd.s32 1, %s1218_s23 }
  0x30   : > { %s79_s26 = ssub.s32 %s1222_s24, %s1334_s19  ;;  %p89_p1 = scmp.ne.s32.totalorder %s1218_s23, %s1214_s22 }
  0x31   : > { %p80_p2 = scmp.eq.s32.totalorder %s79_s26, 0  ;;  %p90_p4 = scmp.eq.s32.totalorder %s1222_s24, 0 }
  0x32   : > { %p1510_p6 = scmp.eq.s32.totalorder %s1289_s25, 1  ;;  %p989_p9 = scmp.lt.s32.totalorder %s1222_s24, 2 }
  0x33   : > { %s1350_s30 = scalar_select %p80_p2, %s1218_s23, %s82_s20  }
  0x34   : > { %p1344_p8 = por %p1510_p6, %p89_p1  ;;  %p91_p13 = por %p90_p4, %p89_p1 }
  0x35   : > { %s247_s7 = sand.u32 1, %s1218_s23   ;;  %s887_s10 = sshll.u32 %s1222_s24, 7 }
  0x36   : > { %s1511_s29 = scalar_select %p1344_p8, 1, 0 }
  0x37   : > { %s886_s9 = sshll.u32 %s247_s7, 3  ;;  %s1357_s13 = scalar_lea.hbm %s1495_s2, %s887_s10 }
  0x38   : > { %s251_s14 = scalar_lea.vmem [#allocation6], %s886_s9  ;;  %p1359_p11 = pnand %p989_p9, %p91_p13 }
  0x39   : > { %s258_s15 = sshll.u32 %s251_s14, 4  ;;  %s248_s17 = scalar_lea.sflag [#allocation3], %s247_s7  ;;  %s259_s15 = int_to_ptr.vmem [resolvable:$true] %s258_s15 }
  0x3a   : > { %s1092_s18 = scalar_lea.hbm %s1357_s13, 128  ;;  %p1094_p5 = pneg %p1359_p11 }
  0x3b   : > { %p1093_p3 = scmp.ne.s32.totalorder %s1357_s13, %s1092_s18  ;;  %s1097_s10 = scalar_lea.hbm %s1495_s2, 256 }
  0x3c   : > { %p1098_p12 = scmp.lt.s32.totalorder %s1357_s13, %s1495_s2  ;;  %p1099_p0 = scmp.lt.s32.totalorder %s1097_s10, %s1092_s18 }
  0x3d   : > { %p1095_p7 = pnand %p1094_p5, %p1093_p3 }
  0x3e   : > { %p1100_p1 = por %p1099_p0, %p1098_p12 }
  0x3f   : > { %p1096_p10 = pneg %p1095_p7 }
  0x41   : > { %p1101_p2 = pnand %p1100_p1, %p1096_p10 }
  0x43   : > { %1104 = shalt.err (!%p1101_p2)
}
  0x44   : > { %s1105_s12 = scalar_lea.vmem %s259_s15, 128  ;;  %s1228_s7 = smov [#allocation6]  }
  0x45   : > { %p1106_p4 = scmp.ne.s32.totalorder %s259_s15, %s1105_s12  ;;  %s1110_s14 = sshll.u32 %s1228_s7, 4  ;;  %s1111_s14 = int_to_ptr.vmem [resolvable:$false] %s1110_s14 }
  0x46   : > { %s1112_s0 = scalar_lea.vmem %s1111_s14, 256  ;;  %p1113_p13 = scmp.lt.s32.totalorder %s259_s15, %s1111_s14 }
  0x47   : > { %p1108_p6 = pnand %p1106_p4, %p1094_p5  ;;  %p1114_p3 = scmp.lt.s32.totalorder %s1112_s0, %s1105_s12 }
  0x49   : > { %p1109_p9 = pneg %p1108_p6  ;;  %p1115_p7 = por %p1114_p3, %p1113_p13 }
  0x4b   : > { %p1116_p8 = pnand %p1115_p7, %p1109_p9 }
  0x4d   : > { %1119 = shalt.err (!%p1116_p8)
}
  0x4e   : > { %979 = dma.hbm_to_vmem [thread:$0]  (!%p1359_p11), %s1357_s13, 128, %s259_s15, %s248_s17  }
  0x4f   : > { %p1513_p10 = scmp.ne.s32.totalorder %s1508_s8, 0 }
  0x50   : > { %p1514_p12 = scmp.eq.s32.totalorder (!%p1513_p10), %s1289_s25, 0 }
  0x51   : > { %267 = sbr.rel (%p1513_p10) target bundleno = 1221 (0x4c5), region = 40 }
  0x56   : > { %1189 = dma.done.wait (%p1514_p12), [#allocation5], 16   ;;  %p1515_p5 = pmov %p1514_p12 }
  0x57   : > { %s1384_s18 = sand.u32 1, %s1214_s22   ;;  %p1516_p8 = scmp.ne.s32.totalorder %s1505_s27, 0 }
  0x58   : > { %1191 = vsyncadd (%p1515_p5), [#allocation5], 4294967280  ;;  %s890_s0 = sshll.u32 %s1384_s18, 3  ;;  %s274_s16 = scalar_lea.sflag [#allocation3], %s1384_s18 }
  0x59   : > { %s1390_s13 = scalar_lea.vmem [#allocation6], %s890_s0 }
  0x5a   : > { %1193 = dma.done.wait (%p1516_p8), %s274_s16, 128  }
  0x5b   : > { %1195 = vsyncadd (%p1516_p8), %s274_s16, 4294967168  ;;  %p1517_p11 = pmov %p1515_p5 }
  0x5c   : > { %p1518_p0 = pmov %p1515_p5 }
  0x5d   : > { %1197 = dma.done.wait (%p1517_p11), [#allocation8], 1024  }
  0x5e   : > { %1199 = vsyncadd (%p1518_p0), [#allocation8], 4294966272 }
  0x5f   : > { %286 = sfence }
  0x60   : > { %v330_v0 = vld [vmem:[#allocation7 + $0x18] sm:$0xff]  ;;  %p319_p1 = scmp.lt.s32.totalorder %s1289_s25, 1  ;;  %v1229_v2 = vmov 0.0   ;;  %v329_v3 = vld [vmem:[#allocation7 + $0x10] sm:$0xff]  ;;  %v328_v5 = vld [vmem:[#allocation7 + $0x8] sm:$0xff]  ;;  %vm331_vm0 = vcmask 261120  }
  0x61   : > { %v409_v1 = vld [vmem:[#allocation7 + $0x38] sm:$0xff]  ;;  %923 = vmatprep.subr.mxu0 %v1229_v2  ;;  %934 = vmatprep.subr.mxu1 %v1229_v2  ;;  %v408_v4 = vld [vmem:[#allocation7 + $0x30] sm:$0xff]  ;;  %v407_v6 = vld [vmem:[#allocation7 + $0x28] sm:$0xff]  ;;  %vm1230_vm1 = vmmov 0   ;;  %vm564_vm2 = vcmask 64512   ;;  %s323_s26 = sld [smem:[#allocation2]] }
  0x62   : > { %924 = vmatpush3.msra.mxu0 %v330_v0  ;;  %935 = vmatpush3.msra.mxu1 %v409_v1  ;;  %s320_s27 = scalar_select %p319_p1, %s1289_s25, 1  ;;  %v327_v7 = vld [vmem:[#allocation7] sm:$0xff]  ;;  %v326_v10 = vld [vmem:[%s1390_s13] sm:$0xff]  ;;  %v632_v1 = vlaneseq  ;;  %vm639_vm4 = vcmask 57344  }
  0x63   : > { %925 = vmatprep.subr.mxu0 %v1229_v2  ;;  %936 = vmatprep.subr.mxu1 %v1229_v2  ;;  %v406_v8 = vld [vmem:[#allocation7 + $0x20] sm:$0xff]  ;;  %v590_v34 = vld [vmem:[%s1497_s4] sm:$0xff]  ;;  %v591_v39 = vld [vmem:[%s1497_s4 + $0x8] sm:$0xff]  ;;  %s894_s7 = sld [smem:[#allocation2 + $0x1]]  ;;  %s318_s14 = scalar_lea.vmem [#allocation10], %s1384_s18 }
  0x64   : > { %926 = vmatpush3.msra.mxu0 %v329_v3  ;;  %937 = vmatpush3.msra.mxu1 %v408_v4  ;;  %s893_s8 = sshll.u32 %s320_s27, 3  ;;  %v633_v4 = vand.u32 127, %v632_v1  ;;  %s905_s16 = sshll.u32 %s1289_s25, 4 }
  0x65   : > { %927 = vmatprep.subr.mxu0 %v1229_v2  ;;  %938 = vmatprep.subr.mxu1 %v1229_v2  ;;  %s322_s20 = scalar_lea.vmem %s1494_s1, %s893_s8  ;;  %s749_s13 = sshll.u32 %s318_s14, 4  ;;  %s750_s13 = int_to_ptr.vmem [resolvable:$true] %s749_s13 }
  0x66   : > { %928 = vmatpush3.msra.mxu0 %v328_v5  ;;  %939 = vmatpush3.msra.mxu1 %v407_v6  ;;  %v325_v9 = vld [vmem:[%s322_s20] sm:$0xff]  ;;  %v635_v5 = vshrl.u32 %v632_v1, 7  ;;  %s747_s15 = scalar_lea.hbm %s1499_s6, %s905_s16  ;;  %s724_s17 = scalar_lea.sflag [#allocation11], %s1384_s18 }
  0x67   : > { %929 = vmatprep.subr.mxu0 %v1229_v2  ;;  %940 = vmatprep.subr.mxu1 %v1229_v2  ;;  %v587_v32 = vstv %s323_s26  ;;  %s1120_s20 = scalar_lea.vmem %s750_s13, 16  ;;  %p1519_p4 = scmp.ne.s32.totalorder %s1511_s29, 0 }
  0x68   : > { %930 = vmatpush3.msra.mxu0 %v327_v7  ;;  %931 = vmatprep.mubr.msk.f32.mxu0 %vm1230_vm1, %v1229_v2  ;;  %p1121_p2 = scmp.ne.s32.totalorder %s750_s13, %s1120_s20  ;;  %s1231_s26 = smov [#allocation10]  }
  0x69   : > { %941 = vmatpush3.msra.mxu1 %v406_v8  ;;  %942 = vmatprep.mubr.msk.f32.mxu1 %vm1230_vm1, %v1229_v2  ;;  %v610_v54 = vstv %s894_s7  ;;  %s1124_s10 = sshll.u32 %s1231_s26, 4  ;;  %s1125_s10 = int_to_ptr.vmem [resolvable:$false] %s1124_s10 }
  0x6a   : > { %932 = vmatmul.mubr.msk.f32.vlgmr.msra.gmra.mxu0 %vm331_vm0, %v325_v9  ;;  %943 = vmatmul.mubr.msk.f32.vlgmr.msra.gmra.mxu1 %vm331_vm0, %v325_v9  ;;  %p1122_p6 = pnand %p1121_p2, %p1519_p4  ;;  %s1126_s11 = scalar_lea.vmem %s1125_s10, 32 }
  0x6b   : > { %945 = vmatprep.subr.msk.mxu0 %vm331_vm0, %v326_v10  ;;  %950 = vmatprep.subr.mxu1 %v1229_v2  ;;  %p1127_p13 = scmp.lt.s32.totalorder %s750_s13, %s1125_s10  ;;  %p1128_p3 = scmp.lt.s32.totalorder %s1126_s11, %s1120_s20 }
  0x6c   : > { %946 = vmatpush3.xpose.msk.msra.mxu0 %vm331_vm0, %v326_v10  ;;  %951 = vmatpush3.msra.mxu1 %v326_v10  ;;  %v636_v10 = vsub.s32 %v633_v4, %v635_v5  ;;  %p1123_p9 = pneg %p1122_p6 }
  0x6d   : > { %952 = vmatprep.mubr.msk.f32.mxu1 %vm1230_vm1, %v1229_v2  ;;  %p1129_p7 = por %p1128_p3, %p1127_p13 }
  0x6f   : > { %p1130_p10 = pnand %p1129_p7, %p1123_p9 }
 0x12a   : > { %v401_v11 = vpop.f32.mrf.mxu0  ;;  %v476_v12 = vpop.f32.mrf.mxu1 }
 0x12b   : > { %947 = vmatprep.mubr.msk.f32.mxu0 %vm331_vm0, %v401_v11 }
 0x12c   : > { %v933_v13 = vpop.f32.mrf.mxu0  ;;  %v944_v14 = vpop.f32.mrf.mxu1  ;;  %948 = vmatmul.mubr.msk.f32.vlgmr.msra.gmra.mxu0 %vm331_vm0, %v476_v12 }
 0x1ec   : > { %v949_v15 = vpop.f32.mrf.mxu0 }
 0x1ed   : > { %v568_v18 = vsel %vm564_vm2, %v949_v15, -inf }
 0x1ee   : > { %v555_v16 = vpop.f32.mrf.mxu0 }
 0x1ef   : > { %v565_v17 = vsel %vm564_vm2, %v555_v16, -inf }
 0x1f0   : > { %566 = vmax.xlane.f32.xlu0 %v565_v17 }
 0x1f4   : > { %569 = vmax.xlane.f32.xlu0 %v568_v18 }
 0x279   : > { %v567_v19 = vpop.xlane.xlu0 %566 }
 0x27a   : > { %v571_v20 = vsub.f32 %v555_v16, %v567_v19 }
 0x27c   : > { %v573_v21 = vmul.f32 1.442695, %v571_v20 }
 0x27d   : > { %v570_v22 = vpop.xlane.xlu0 %569 }
 0x27e   : > { %1031 = vpow2.f32 %v573_v21  ;;  %v572_v23 = vsub.f32 %v949_v15, %v570_v22 }
 0x280   : > { %v575_v24 = vmul.f32 1.442695, %v572_v23 }
 0x282   : > { %1033 = vpow2.f32 %v575_v24 }
 0x28b   : > { %v1032_v25 = vpop.eup %1031 }
 0x28c   : > { %v577_v26 = vsel %vm564_vm2, %v1032_v25, 0.0 }
 0x28d   : > { %578 = vadd.xlane.f32.xlu1 %v577_v26 }
 0x28f   : > { %v1034_v27 = vpop.eup %1033 }
 0x290   : > { %v580_v28 = vsel %vm564_vm2, %v1034_v27, 0.0 }
 0x291   : > { %581 = vadd.xlane.f32.xlu1 %v580_v28 }
 0x316   : > { %v579_v29 = vpop.xlane.xlu1 %578 }
 0x317   : > { %1035 = vrcp.f32 %v579_v29 }
 0x31a   : > { %v582_v30 = vpop.xlane.xlu1 %581 }
 0x31b   : > { %1037 = vrcp.f32 %v582_v30 }
 0x324   : > { %v1036_v31 = vpop.eup %1035 }
 0x325   : > { %v585_v33 = vmul.f32 %v1036_v31, %v1032_v25 }
 0x327   : > { %v588_v35 = vmul.f32 %v587_v32, %v585_v33 }
 0x328   : > { %v1038_v36 = vpop.eup %1037 }
 0x329   : > { %v592_v37 = vadd.f32 %v590_v34, %v588_v35  ;;  %v586_v38 = vmul.f32 %v1038_v36, %v1034_v27 }
 0x32b   : > { %v596_v40 = vadd.f32 1e-08, %v592_v37  ;;  %v589_v41 = vmul.f32 %v587_v32, %v586_v38  ;;  %v594_v45 = vsub.f32 0.0, %v592_v37 }
 0x32d   : > { %1039 = vlog2.f32 %v596_v40  ;;  %v593_v42 = vadd.f32 %v591_v39, %v589_v41 }
 0x32f   : > { %v597_v43 = vadd.f32 1e-08, %v593_v42  ;;  %v595_v50 = vsub.f32 0.0, %v593_v42 }
 0x331   : > { %1041 = vlog2.f32 %v597_v43 }
 0x33a   : > { %v1040_v44 = vpop.eup %1039 }
 0x33b   : > { %v599_v46 = vmul.f32 0.6931472, %v1040_v44 }
 0x33d   : > { %v602_v47 = vmul.f32 %v599_v46, %v594_v45 }
 0x33e   : > { %v1042_v48 = vpop.eup %1041 }
 0x33f   : > { %v604_v49 = vsel %vm564_vm2, %v602_v47, 0.0  ;;  %v601_v51 = vmul.f32 0.6931472, %v1042_v48 }
 0x340   : > { %605 = vadd.xlane.f32.xlu0 %v604_v49 }
 0x341   : > { %v603_v52 = vmul.f32 %v601_v51, %v595_v50 }
 0x343   : > { %v607_v53 = vsel %vm564_vm2, %v603_v52, 0.0 }
 0x344   : > { %608 = vadd.xlane.f32.xlu1 %v607_v53 }
 0x3c9   : > { %v606_v55 = vpop.xlane.xlu0 %605 }
 0x3ca   : > { %v611_v56 = vmul.f32 %v610_v54, %v606_v55 }
 0x3cc   : > { %v900_v57 = vmul.f32 -1.442695, %v611_v56 }
 0x3cd   : > { %v609_v58 = vpop.xlane.xlu1 %608 }
 0x3ce   : > { %1043 = vpow2.f32 %v900_v57  ;;  %v612_v59 = vmul.f32 %v610_v54, %v609_v58 }
 0x3d0   : > { %v901_v60 = vmul.f32 -1.442695, %v612_v59 }
 0x3d2   : > { %1045 = vpow2.f32 %v901_v60 }
 0x3db   : > { %v1044_v61 = vpop.eup %1043 }
 0x3dc   : > { %v619_v62 = vadd.f32 1.0, %v1044_v61 }
 0x3de   : > { %1047 = vrcp.f32 %v619_v62 }
 0x3df   : > { %v1046_v63 = vpop.eup %1045 }
 0x3e0   : > { %v620_v0 = vadd.f32 1.0, %v1046_v63 }
 0x3e2   : > { %1049 = vrcp.f32 %v620_v0 }
 0x3eb   : > { %v1048_v2 = vpop.eup %1047 }
 0x3ec   : > { %v625_v3 = vmul.f32 2.0, %v1048_v2 }
 0x3ee   : > { %v627_v8 = vsub.f32 2.0, %v625_v3 }
 0x3ef   : > { %v1050_v6 = vpop.eup %1049 }
 0x3f0   : > { %v626_v7 = vmul.f32 2.0, %v1050_v6 }
 0x3f2   : > { %v628_v9 = vsub.f32 2.0, %v626_v7 }
 0x3f4   : > { %vm629_vm3 = vcmp.ge.f32.partialorder %v627_v8, %v628_v9 }
 0x3f5   : > { %v643_v11 = vsel %vm629_vm3, %v592_v37, %v593_v42  ;;  %v630_v12 = vsel %vm629_vm3, %v627_v8, %v628_v9 }
 0x3f6   : > { %953 = vmatmul.mubr.msk.f32.vlgmr.msra.gmra.mxu1 %vm564_vm2, %v643_v11  ;;  %v637_v13 = vrot.slane %v630_v12, %v636_v10 }
 0x3f8   : > { %640 = vst.msk [vmem:[%s318_s14] sm:$0x1] %vm639_vm4, %v637_v13 }
 0x3f9   : > { %1133 = shalt.err (!%p1130_p10)
}
 0x3fa   : > { %s1134_s9 = scalar_lea.hbm %s747_s15, 16  ;;  %s1138_s14 = scalar_lea.hbm %s1499_s6, 32 }
 0x3fb   : > { %p1135_p12 = scmp.ne.s32.totalorder %s747_s15, %s1134_s9  ;;  %p1139_p11 = scmp.lt.s32.totalorder %s747_s15, %s1499_s6 }
 0x3fc   : > { %p1140_p0 = scmp.lt.s32.totalorder %s1138_s14, %s1134_s9 }
 0x3fd   : > { %p1136_p5 = pnand %p1135_p12, %p1519_p4 }
 0x3fe   : > { %p1141_p1 = por %p1140_p0, %p1139_p11 }
 0x3ff   : > { %p1137_p8 = pneg %p1136_p5 }
 0x401   : > { %p1142_p2 = pnand %p1141_p1, %p1137_p8 }
 0x403   : > { %1145 = shalt.err (!%p1142_p2)
}
 0x404   : > { %966 = dma.vmem_to_hbm [thread:$0]  (%p1519_p4), %s750_s13, 16, %s747_s15, %s724_s17  }
 0x405   : > { %s904_s8 = sshll.u32 %s1289_s25, 7  ;;  %s312_s20 = scalar_lea.vmem [#allocation9], %s890_s0 }
 0x406   : > { %s736_s26 = sshll.u32 %s312_s20, 4  ;;  %s1449_s12 = scalar_lea.hbm %s1498_s5, %s904_s8  ;;  %s1451_s26 = int_to_ptr.vmem [resolvable:$true] %s736_s26 }
 0x407   : > { %s719_s9 = scalar_lea.sflag [#allocation4], %s1384_s18  ;;  %s1146_s13 = scalar_lea.vmem %s1451_s26, 128 }
 0x408   : > { %p1147_p6 = scmp.ne.s32.totalorder %s1451_s26, %s1146_s13  ;;  %s1232_s25 = smov [#allocation9]  }
 0x409   : > { %s1150_s0 = sshll.u32 %s1232_s25, 4  ;;  %s1151_s0 = int_to_ptr.vmem [resolvable:$false] %s1150_s0 }
 0x40a   : > { %p1148_p9 = pnand %p1147_p6, %p1519_p4  ;;  %s1152_s15 = scalar_lea.vmem %s1151_s0, 256 }
 0x40b   : > { %p1153_p3 = scmp.lt.s32.totalorder %s1451_s26, %s1151_s0  ;;  %p1154_p7 = scmp.lt.s32.totalorder %s1152_s15, %s1146_s13 }
 0x40c   : > { %p1149_p13 = pneg %p1148_p9 }
 0x40d   : > { %p1155_p10 = por %p1154_p7, %p1153_p3 }
 0x40f   : > { %p1156_p12 = pnand %p1155_p10, %p1149_p13 }
 0x4b6   : > { %v713_v14 = vpop.f32.mrf.mxu1 }
 0x4b7   : > { %717 = vst.msk [vmem:[%s312_s20] sm:$0xff] %vm331_vm0, %v713_v14 }
 0x4b8   : > { %v954_v15 = vpop.f32.mrf.mxu1 }
 0x4b9   : > { %1159 = shalt.err (!%p1156_p12)
}
 0x4ba   : > { %s1160_s17 = scalar_lea.hbm %s1449_s12, 128  ;;  %s1164_s14 = scalar_lea.hbm %s1498_s5, 256 }
 0x4bb   : > { %p1161_p5 = scmp.ne.s32.totalorder %s1449_s12, %s1160_s17  ;;  %p1165_p0 = scmp.lt.s32.totalorder %s1449_s12, %s1498_s5 }
 0x4bc   : > { %p1166_p1 = scmp.lt.s32.totalorder %s1164_s14, %s1160_s17 }
 0x4bd   : > { %p1162_p8 = pnand %p1161_p5, %p1519_p4 }
 0x4be   : > { %p1167_p2 = por %p1166_p1, %p1165_p0 }
 0x4bf   : > { %p1163_p11 = pneg %p1162_p8 }
 0x4c1   : > { %p1168_p6 = pnand %p1167_p2, %p1163_p11 }
 0x4c3   : > { %1171 = shalt.err (!%p1168_p6)
}
 0x4c4   : > { %965 = dma.vmem_to_hbm [thread:$0]  (%p1519_p4), %s1451_s26, 128, %s1449_s12, %s719_s9  }
 0x4c5 PF: > { %s761_s8 = sand.u32 1, %s1210_s21   ;;  %p1520_p9 = scmp.ne.s32.totalorder %s1506_s28, 0 }
 0x4c6   : > { %p1521_p13 = scmp.ge.s32.totalorder %s1222_s24, 2  ;;  %s762_s20 = scalar_lea.sflag [#allocation4], %s761_s8 }
 0x4c8   : > { %p981_p3 = pnand %p1521_p13, %p1520_p9 }
 0x4ca   : > { %p982_p7 = pneg %p981_p3 }
 0x4cc   : > { %1201 = dma.done.wait (%p982_p7), %s762_s20, 128  }
 0x4cd   : > { %1203 = vsyncadd (%p982_p7), %s762_s20, 4294967168  ;;  %s771_s10 = scalar_lea.sflag [#allocation11], %s761_s8 }
 0x4ce   : > { %1205 = dma.done.wait (%p982_p7), %s771_s10, 16  }
 0x4cf   : > { %1207 = vsyncadd (%p982_p7), %s771_s10, 4294967280  ;;  %p25_p4 = scmp.ge.s32.totalorder %s1334_s19, 4   ;;  %s1522_s21 = smov %s1214_s22 }
 0x4d0   : > { %s1523_s22 = smov %s1218_s23  ;;  %s1524_s23 = smov %s1350_s30 }
 0x4d1   : > { %s1525_s24 = smov %s1334_s19  ;;  %27 = sbr.rel (!%p25_p4) target bundleno = 11 (0xb), region = 115 }
 0x4d6   :  { %775 = vsyncpa [#allocation3], 1 }
 0x4d7   :  { %777 = vsyncpa [#allocation3 + $0x1], 1 }
 0x4d8   :  { %778 = vsyncpa [#allocation8], 1 }
 0x4d9   :  { %779 = vsyncpa [#allocation4], 1 }
 0x4da   :  { %781 = vsyncpa [#allocation4 + $0x1], 1 }
 0x4db   :  { %782 = vsyncpa [#allocation11], 1 }
 0x4dc   :  { %784 = vsyncpa [#allocation11 + $0x1], 1 }
 0x4dd   :  { %785 = vsyncpa [#allocation5], 1 }
 0x4de   :  { %787 = vsyncpa [#allocation5 + $0x1], 1 }

</bundles_post_ra>
